<compile_context>
chip_gen: v7x
topology: tpu7x:2x2x1
jax: 0.10.0
libtpu: 0.0.40
codegen_flags: <defaults>
</compile_context>

<pallas_src>
import jax
import jax.numpy as jnp
from jax.experimental import pallas as pl
from jax.experimental.pallas import tpu as pltpu

D = 100  # logical feature dim from nn.Parameter(torch.randn((100, 100)))


def _fused_kernel(x_ref, y_ref, w_ref, o_ref):
    # Fused hot path: add -> MXU matmul (f32 accumulate) -> relu.
    z = x_ref[...] + y_ref[...]
    acc = jnp.dot(z, w_ref[...], preferred_element_type=jnp.float32)
    o_ref[...] = jnp.maximum(acc, 0.0).astype(o_ref.dtype)


def multi_input_forward(x: jax.Array, y: jax.Array, w: jax.Array,
                        *, tm: int = 1024,
                        small_batch_cutoff: int = 256) -> jax.Array:
    assert x.shape == y.shape, "x and y must have the same shape"
    B, Din = x.shape
    assert w.shape == (Din, Din)

    cost = pl.CostEstimate(
        flops=2 * B * Din * Din,
        transcendentals=0,
        bytes_accessed=(3 * B * Din + Din * Din) * x.dtype.itemsize,
    )

    if B <= small_batch_cutoff:
        # Small batch: one un-gridded invocation, everything resident in VMEM.
        # No padding / slicing HLOs around the custom call.
        return pl.pallas_call(
            _fused_kernel,
            out_shape=jax.ShapeDtypeStruct((B, Din), x.dtype),
            in_specs=[
                pl.BlockSpec(memory_space=pltpu.MemorySpace.VMEM),
                pl.BlockSpec(memory_space=pltpu.MemorySpace.VMEM),
                pl.BlockSpec(memory_space=pltpu.MemorySpace.VMEM),
            ],
            out_specs=pl.BlockSpec(memory_space=pltpu.MemorySpace.VMEM),
            cost_estimate=cost,
        )(x, y, w)

    # Large batch: tile rows at tm with a ragged cdiv grid; w stays resident
    # across steps via a constant index_map. Batch axis "parallel" so both
    # TensorCores are used on v7x.
    grid = (pl.cdiv(B, tm),)
    return pl.pallas_call(
        _fused_kernel,
        out_shape=jax.ShapeDtypeStruct((B, Din), x.dtype),
        grid=grid,
        in_specs=[
            pl.BlockSpec((tm, Din), lambda i: (i, 0)),
            pl.BlockSpec((tm, Din), lambda i: (i, 0)),
            pl.BlockSpec((Din, Din), lambda i: (0, 0)),
        ],
        out_specs=pl.BlockSpec((tm, Din), lambda i: (i, 0)),
        compiler_params=pltpu.CompilerParams(
            dimension_semantics=("parallel",)),
        cost_estimate=cost,
    )(x, y, w)


def reference_forward(x, y, w):
    return jnp.maximum((x + y) @ w, 0.0)


if __name__ == "__main__":
    key = jax.random.PRNGKey(0)
    kx, ky, kw = jax.random.split(key, 3)

    # Deterministic parameter init (mirrors torch.randn((100, 100))).
    w = jax.random.normal(kw, (D, D), dtype=jnp.float32)

    # Small-batch path (module's typical use).
    B = 8
    x = jax.random.normal(kx, (B, D), dtype=jnp.float32)
    y = jax.random.normal(ky, (B, D), dtype=jnp.float32)
    out = multi_input_forward(x, y, w)
    jax.block_until_ready(out)
    ref = reference_forward(x, y, w)
    assert out.shape == (B, D)
    assert jnp.allclose(out, ref, atol=1e-4, rtol=1e-4), "small-batch mismatch"

    # Large-batch tiled path, deliberately not a multiple of tm to exercise
    # the ragged cdiv grid and output-write masking.
    B2 = 2144
    kx2, ky2 = jax.random.split(kx)
    x2 = jax.random.normal(kx2, (B2, D), dtype=jnp.float32)
    y2 = jax.random.normal(ky2, (B2, D), dtype=jnp.float32)
    out2 = multi_input_forward(x2, y2, w)
    jax.block_until_ready(out2)
    ref2 = reference_forward(x2, y2, w)
    assert out2.shape == (B2, D)
    assert jnp.allclose(out2, ref2, atol=1e-4, rtol=1e-4), "tiled mismatch"

    print("KERNEL_OK")
</pallas_src>

<mosaic_0001>
module attributes {stable_mosaic.version = 11 : i64} {
  func.func @_fused_kernel(%arg0: memref<8x100xf32, #tpu.memory_space<vmem>>, %arg1: memref<8x100xf32, #tpu.memory_space<vmem>>, %arg2: memref<100x100xf32, #tpu.memory_space<vmem>>, %arg3: memref<8x100xf32, #tpu.memory_space<vmem>>) attributes {dimension_semantics = [], scalar_prefetch = 0 : i64, scratch_operands = 0 : i64, tpu.core_type = #tpu.core_type<tc>} {
    %c0 = arith.constant 0 : index
    %c0_0 = arith.constant 0 : index
    %0 = vector.load %arg0[%c0, %c0_0] : memref<8x100xf32, #tpu.memory_space<vmem>>, vector<8x100xf32>
    %c0_1 = arith.constant 0 : index
    %c0_2 = arith.constant 0 : index
    %1 = vector.load %arg1[%c0_1, %c0_2] : memref<8x100xf32, #tpu.memory_space<vmem>>, vector<8x100xf32>
    %2 = arith.addf %0, %1 : vector<8x100xf32>
    %c0_3 = arith.constant 0 : index
    %c0_4 = arith.constant 0 : index
    %3 = vector.load %arg2[%c0_3, %c0_4] : memref<100x100xf32, #tpu.memory_space<vmem>>, vector<100x100xf32>
    %cst = arith.constant dense<0.000000e+00> : vector<8x100xf32>
    %4 = tpu.matmul %2, %3, %cst {dimension_numbers = #tpu.dot_dimension_numbers<[1], [0], [0], [1], [0, 0, 1, 1], [], []>} : vector<8x100xf32>, vector<100x100xf32>, vector<8x100xf32> -> vector<8x100xf32>
    %cst_5 = arith.constant 0.000000e+00 : f32
    %5 = vector.broadcast %cst_5 : f32 to vector<8x100xf32>
    %6 = arith.maximumf %4, %5 : vector<8x100xf32>
    %c0_6 = arith.constant 0 : index
    %c0_7 = arith.constant 0 : index
    %7 = vector.load %arg3[%c0_6, %c0_7] : memref<8x100xf32, #tpu.memory_space<vmem>>, vector<8x100xf32>
    tpu.vector_store %arg3[%c0_6, %c0_7], %6 {strides = array<i32>} : memref<8x100xf32, #tpu.memory_space<vmem>>, vector<8x100xf32>,
    return
  }
}

</mosaic_0001>

<bundles_post_ra>
// kernel: tpu_custom_call.1
= control target key start
LH: loop header
LB: loop body
LE: loop exit
PB: predicated region body
PF: predicated region fallthrough
CT: control target
= control target key end

     0   :  { %8 = vsyncpa [#allocation3], 0  ;;  %s407_s0 = inlined_call_operand.hbm [shape: f32[8,100], index: 0, kind: input, shape index: {}]   ;;  %s408_s1 = inlined_call_operand.hbm [shape: f32[8,100], index: 1, kind: input, shape index: {}]   ;;  %s409_s2 = inlined_call_operand.hbm [shape: f32[100,100], index: 2, kind: input, shape index: {}]   ;;  %s410_s3 = inlined_call_operand.hbm [shape: f32[8,100], index: 3, kind: output, shape index: {}]  }
   0x1   :  { %9 = vsyncpa [#allocation6], 0 }
   0x2   :  { %10 = vsyncpa [#allocation4], 0  ;;  %s330_s12 = smov [#allocation5]   ;;  %s331_s14 = smov [#allocation2]  }
   0x3   :  { %s27_s13 = sshll.u32 %s330_s12, 4  ;;  %s17_s15 = sshll.u32 %s331_s14, 4  ;;  %s28_s13 = int_to_ptr.vmem [resolvable:$true] %s27_s13  ;;  %s18_s15 = int_to_ptr.vmem [resolvable:$true] %s17_s15 }
   0x4   :  { %s236_s18 = scalar_lea.hbm %s408_s1, 128 }
   0x5   :  { %p237_p0 = scmp.ne.s32.totalorder %s408_s1, %s236_s18  ;;  %p240_p1 = scmp.lt.u32.totalorder %s236_s18, %s408_s1 }
   0x7   :  { %p242_p2 = pnand %p240_p1, %p237_p0 }
   0x9   :  { %245 = shalt.err (!%p242_p2)
}
   0xa   :  { %s246_s23 = scalar_lea.vmem %s28_s13, 128  ;;  %p251_p4 = scmp.lt.s32.totalorder %s28_s13, %s28_s13 }
   0xb   :  { %p247_p3 = scmp.ne.s32.totalorder %s28_s13, %s246_s23  ;;  %p252_p5 = scmp.lt.s32.totalorder %s246_s23, %s246_s23 }
   0xd   :  { %p253_p6 = por %p252_p5, %p251_p4 }
   0xf   :  { %p254_p7 = pnand %p253_p6, %p247_p3 }
  0x11   :  { %257 = shalt.err (!%p254_p7)
}
  0x12   :  { %30 = dma.hbm_to_vmem [thread:$0]  %s408_s1, 128, %s28_s13, [#allocation6]  }
  0x13   :  { %s258_s28 = scalar_lea.hbm %s407_s0, 128 }
  0x14   :  { %p259_p8 = scmp.ne.s32.totalorder %s407_s0, %s258_s28  ;;  %p262_p9 = scmp.lt.u32.totalorder %s258_s28, %s407_s0 }
  0x16   :  { %p264_p10 = pnand %p262_p9, %p259_p8 }
  0x18   :  { %267 = shalt.err (!%p264_p10)
}
  0x19   :  { %s268_s6 = scalar_lea.vmem %s18_s15, 128  ;;  %p273_p12 = scmp.lt.s32.totalorder %s18_s15, %s18_s15 }
  0x1a   :  { %p269_p11 = scmp.ne.s32.totalorder %s18_s15, %s268_s6  ;;  %p274_p13 = scmp.lt.s32.totalorder %s268_s6, %s268_s6 }
  0x1c   :  { %p275_p0 = por %p274_p13, %p273_p12 }
  0x1e   :  { %p276_p1 = pnand %p275_p0, %p269_p11 }
  0x20   :  { %279 = shalt.err (!%p276_p1)
}
  0x21   :  { %20 = dma.hbm_to_vmem [thread:$0]  %s407_s0, 128, %s18_s15, [#allocation3]  }
  0x22   :  { %s332_s8 = smov [#allocation7]   ;;  %s280_s12 = scalar_lea.hbm %s409_s2, 1664 }
  0x23   :  { %s36_s9 = sshll.u32 %s332_s8, 4  ;;  %p281_p2 = scmp.ne.s32.totalorder %s409_s2, %s280_s12  ;;  %s37_s9 = int_to_ptr.vmem [resolvable:$true] %s36_s9 }
  0x24   :  { %p284_p3 = scmp.lt.u32.totalorder %s280_s12, %s409_s2 }
  0x26   :  { %p286_p4 = pnand %p284_p3, %p281_p2 }
  0x28   :  { %289 = shalt.err (!%p286_p4)
}
  0x29   :  { %s290_s18 = scalar_lea.vmem %s37_s9, 1664  ;;  %p295_p6 = scmp.lt.s32.totalorder %s37_s9, %s37_s9 }
  0x2a   :  { %p291_p5 = scmp.ne.s32.totalorder %s37_s9, %s290_s18  ;;  %p296_p7 = scmp.lt.s32.totalorder %s290_s18, %s290_s18 }
  0x2c   :  { %p297_p8 = por %p296_p7, %p295_p6 }
  0x2e   :  { %p298_p9 = pnand %p297_p8, %p291_p5 }
  0x30   :  { %301 = shalt.err (!%p298_p9)
}
  0x31   :  { %s333_s0 = smov 128   ;;  %s334_s15 = smov 8  }
  0x32   :  { %42 = dma.hbm_to_vmem [thread:$0]  %s409_s2, 1664, %s37_s9, [#allocation6], %s333_s0, %s333_s0, %s334_s15  }
  0x33   :  { %324 = dma.done.wait [#allocation3], 128  }
  0x34   :  { %325 = vsyncadd [#allocation3], 4294967168 }
  0x35   :  { %326 = dma.done.wait [#allocation6], 1792  }
  0x36   :  { %327 = vsyncadd [#allocation6], 4294965504  ;;  %v335_v0 = vmov 0.0|0.0   ;;  %vm336_vm0 = vmmov 0   ;;  %v337_v1 = vmov 0.0   ;;  %v55_v2 = vld [vmem:[#allocation7] sm:$0xff] }
  0x37   :  { %209 = vmatprep.subr.bf16.mxu0 %v335_v0  ;;  %206 = vmatprep.mubr.msk.f32.mxu0 %vm336_vm0, %v337_v1  ;;  %v56_v3 = vld [vmem:[#allocation7 + $0x8] sm:$0xff]  ;;  %v57_v4 = vld [vmem:[#allocation7 + $0x10] sm:$0xff]  ;;  %v58_v6 = vld [vmem:[#allocation7 + $0x18] sm:$0xff]  ;;  %vm72_vm1 = vcmask 1043456   ;;  %vm68_vm2 = vcmask 818176   ;;  %s338_s2 = smov [#allocation8]  }
  0x38   :  { %v210_v5 = vpack.c.bf16 %v56_v3, %v55_v2  ;;  %v213_v7 = vpack.c.bf16 %v58_v6, %v57_v4  ;;  %v59_v8 = vld [vmem:[#allocation7 + $0x20] sm:$0xff]  ;;  %v60_v9 = vld [vmem:[#allocation7 + $0x28] sm:$0xff]  ;;  %v61_v11 = vld [vmem:[#allocation7 + $0x30] sm:$0xff]  ;;  %s154_s21 = sshll.u32 %s338_s2, 4  ;;  %s155_s21 = int_to_ptr.vmem [resolvable:$true] %s154_s21 }
  0x39   :  { %v216_v10 = vpack.c.bf16 %v60_v9, %v59_v8  ;;  %v62_v12 = vld [vmem:[#allocation7 + $0x38] sm:$0xff]  ;;  %v63_v14 = vld [vmem:[#allocation7 + $0x40] sm:$0xff]  ;;  %v64_v15 = vld [vmem:[#allocation7 + $0x48] sm:$0xff]  ;;  %s302_s22 = scalar_lea.vmem %s155_s21, 128  ;;  %p307_p11 = scmp.lt.s32.totalorder %s155_s21, %s155_s21 }
  0x3a   :  { %211 = vmatpush3.bf16.msra.mxu0 %v210_v5  ;;  %v219_v13 = vpack.c.bf16 %v62_v12, %v61_v11  ;;  %v222_v16 = vpack.c.bf16 %v64_v15, %v63_v14  ;;  %v65_v17 = vld [vmem:[#allocation7 + $0x50] sm:$0xff]  ;;  %v66_v18 = vld [vmem:[#allocation7 + $0x58] sm:$0xff]  ;;  %v67_v22 = vld [vmem:[#allocation7 + $0x60] sm:$0xf]  ;;  %p303_p10 = scmp.ne.s32.totalorder %s155_s21, %s302_s22  ;;  %p308_p12 = scmp.lt.s32.totalorder %s302_s22, %s302_s22 }
  0x3b   :  { %212 = vmatprep.subr.bf16.mxu0 %v335_v0  ;;  %v225_v19 = vpack.c.bf16 %v66_v18, %v65_v17  ;;  %v52_v20 = vld [vmem:[#allocation2] sm:$0xff]  ;;  %v53_v21 = vld [vmem:[#allocation5] sm:$0xff] }
  0x3c   :  { %v54_v23 = vadd.f32 %v53_v21, %v52_v20  ;;  %p309_p13 = por %p308_p12, %p307_p11 }
  0x3e   :  { %214 = vmatpush3.bf16.msra.mxu0 %v213_v7  ;;  %p310_p0 = pnand %p309_p13, %p303_p10 }
  0x3f   :  { %215 = vmatprep.subr.bf16.mxu0 %v335_v0 }
  0x42   :  { %217 = vmatpush3.bf16.msra.mxu0 %v216_v10 }
  0x43   :  { %218 = vmatprep.subr.bf16.mxu0 %v335_v0 }
  0x46   :  { %220 = vmatpush3.bf16.msra.mxu0 %v219_v13 }
  0x47   :  { %221 = vmatprep.subr.bf16.mxu0 %v335_v0 }
  0x4a   :  { %223 = vmatpush3.bf16.msra.mxu0 %v222_v16 }
  0x4b   :  { %224 = vmatprep.subr.bf16.mxu0 %v335_v0 }
  0x4e   :  { %226 = vmatpush3.bf16.msra.mxu0 %v225_v19 }
  0x4f   :  { %204 = vmatprep.subr.mxu0 %v337_v1 }
  0x52   :  { %205 = vmatpush3.msk.msra.mxu0 %vm72_vm1, %v67_v22 }
  0x53   :  { %207 = vmatmul.mubr.msk.f32.vlgmr.msra.gmra.mrb[0].mxu0 %vm68_vm2, %v54_v23 }
 0x126   :  { %v142_v24 = vpop.f32.mrb[0].mxu0 }
 0x127   :  { %v146_v25 = vmax.f32 %v142_v24, 0.0  ;;  %v208_v26 = vpop.f32.mrb[1].mxu0 }
 0x129   :  { %147 = vst.msk [vmem:[#allocation8] sm:$0xff] %vm68_vm2, %v146_v25 }
 0x12a   :  { %313 = shalt.err (!%p310_p0)
}
 0x12b   :  { %s314_s25 = scalar_lea.hbm %s410_s3, 128 }
 0x12c   :  { %p315_p1 = scmp.ne.s32.totalorder %s410_s3, %s314_s25  ;;  %p318_p2 = scmp.lt.u32.totalorder %s314_s25, %s410_s3 }
 0x12e   :  { %p320_p3 = pnand %p318_p2, %p315_p1 }
 0x130   :  { %323 = shalt.err (!%p320_p3)
}
 0x131   :  { %157 = dma.vmem_to_hbm [thread:$0]  %s155_s21, 128, %s410_s3, [#allocation4]  }
 0x132   :  { %328 = dma.done.wait [#allocation4], 128  }
 0x133   :  { %329 = vsyncadd [#allocation4], 4294967168 }
 0x134   :  { %161 = vsyncpa [#allocation3], 1 }
 0x135   :  { %162 = vsyncpa [#allocation6], 1 }
 0x136   :  { %163 = vsyncpa [#allocation4], 1 }

</bundles_post_ra>
